<compile_context>
chip_gen: v6e
topology: v6e:2x2x1
jax: 0.10.0
libtpu: 0.0.40
codegen_flags: <defaults>
</compile_context>

<pallas_src>
import jax
import jax.numpy as jnp
import numpy as np
from jax.experimental import pallas as pl
from jax.experimental.pallas import tpu as pltpu


def _round_up(x: int, m: int) -> int:
    return (x + m - 1) // m * m


# ---------------------------------------------------------------------------
# Kernel 1: fully fused.  z / rel_emb resident in VMEM, per-tile row gathers
# done in-kernel, exact-f32 VPU multiply + row reduce, lane-dense output.
# ---------------------------------------------------------------------------
def _distmult_fused_kernel(src_ref, dst_ref, et_ref, z_ref, rel_ref, out_ref):
    # src/dst/et : (1, tile) int32 edge-index blocks, streamed per grid step
    # z_ref      : (N, H)  node table, resident across the whole grid
    # rel_ref    : (R, H)  relation table, resident across the whole grid
    # out_ref    : (1, tile) f32 scores (lane-dense store)
    src = src_ref[0, :]                                   # (tile,)
    dst = dst_ref[0, :]
    et = et_ref[0, :]

    z = z_ref[...].astype(jnp.float32)                    # no-op for f32 inputs
    rel_tab = rel_ref[...].astype(jnp.float32)

    # In-kernel row gathers on the VMEM-resident tables.  mode="clip": out of
    # range indices are clamped (PyTorch would raise); padded edges carry
    # index 0 and their scores are sliced off in the wrapper.
    z_src = jnp.take(z, src, axis=0, mode="clip")         # (tile, H)
    z_dst = jnp.take(z, dst, axis=0, mode="clip")         # (tile, H)
    rel = jnp.take(rel_tab, et, axis=0, mode="clip")      # (tile, H)

    p = z_src * rel * z_dst                                # exact f32, VPU
    out_ref[...] = jnp.sum(p, axis=1)[None, :].astype(out_ref.dtype)


# ---------------------------------------------------------------------------
# Kernel 2: streaming fallback (gathers done by XLA in the wrapper).
# Same exact-f32 math and lane-dense output.
# ---------------------------------------------------------------------------
def _distmult_streaming_kernel(zs_ref, zd_ref, rel_ref, out_ref):
    # zs/zd/rel : (tile, H) pre-gathered rows      out : (1, tile) f32
    p = (zs_ref[...].astype(jnp.float32)
         * rel_ref[...].astype(jnp.float32)
         * zd_ref[...].astype(jnp.float32))
    out_ref[...] = jnp.sum(p, axis=1)[None, :].astype(out_ref.dtype)


def distmult_decoder_forward(z, edge_index, edge_type, rel_emb, *, tile_e=2048,
                             stream_dtype=None, fuse_gather=True):
    """DistMultDecoder.forward.

    z            : (N, H) node embeddings (f32 or bf16).
    edge_index   : (2, E) integer node indices.
    edge_type    : (E,)   integer relation indices.
    rel_emb      : (R, H) relation embeddings.
    tile_e       : edges per grid step (sweep 1024-8192 for large E).
    stream_dtype : optionally jnp.bfloat16 to halve feature HBM traffic.
    fuse_gather  : gather rows inside the kernel when z fits in VMEM.
    Returns (E,) float32 scores.
    """
    E = int(edge_type.shape[0])
    N, H = (int(s) for s in z.shape)
    R = int(rel_emb.shape[0])

    # Lane-aligned edge tiling (last block dim must be a multiple of 128).
    tile = max(128, _round_up(min(int(tile_e), max(E, 1)), 128))
    e_pad = _round_up(max(E, 1), tile)
    grid = (e_pad // tile,)

    src = edge_index[0].astype(jnp.int32)
    dst = edge_index[1].astype(jnp.int32)
    et = edge_type.astype(jnp.int32)
    if e_pad != E:
        pad = (0, e_pad - E)
        src = jnp.pad(src, pad)    # padded edges read node 0 / relation 0;
        dst = jnp.pad(dst, pad)    # their scores are sliced off at the end.
        et = jnp.pad(et, pad)
    src2 = src.reshape(1, e_pad)
    dst2 = dst.reshape(1, e_pad)
    et2 = et.reshape(1, e_pad)

    if stream_dtype is not None:
        z_feat = z.astype(stream_dtype)
        rel_feat = rel_emb.astype(stream_dtype)
    else:
        z_feat = z
        rel_feat = rel_emb

    # Lane-dense output: (1, e_pad), blocked (1, tile).
    out_shape = jax.ShapeDtypeStruct((1, e_pad), jnp.float32)
    out_spec = pl.BlockSpec((1, tile), lambda i: (0, i))
    idx_spec = pl.BlockSpec((1, tile), lambda i: (0, i))

    # VMEM budget from the actual hardware, with headroom (not an exact-64MiB
    # cap and no blanket 32MiB floor).
    try:
        vmem_cap = int(pltpu.get_tpu_info().vmem_capacity_bytes)
    except Exception:
        vmem_cap = 64 * 1024 * 1024  # conservative (v7x per-core VMEM)

    # Fused working set: resident tables (counted twice: possible double
    # buffering + in-kernel f32 copies), streamed index/output blocks, and the
    # (tile, H) f32 gather/product intermediates.
    fused_need = (2 * N * H * 4 + 2 * R * H * 4
                  + 8 * tile * 4                 # 3 idx blocks x2 bufs + out x2
                  + 4 * tile * H * 4)            # in-kernel intermediates
    use_fused = fuse_gather and (fused_need + (8 << 20)) <= int(0.7 * vmem_cap)

    if use_fused:
        vmem_limit = int(min(0.85 * vmem_cap, max(2 * fused_need, 16 << 20)))
        try:
            out = pl.pallas_call(
                _distmult_fused_kernel,
                out_shape=out_shape,
                grid=grid,
                in_specs=[
                    idx_spec,                                   # src indices
                    idx_spec,                                   # dst indices
                    idx_spec,                                   # relation ids
                    pl.BlockSpec((N, H), lambda i: (0, 0)),     # z (resident)
                    pl.BlockSpec((R, H), lambda i: (0, 0)),     # rel_emb (resident)
                ],
                out_specs=out_spec,
                compiler_params=pltpu.CompilerParams(
                    dimension_semantics=("parallel",),
                    vmem_limit_bytes=vmem_limit,
                ),
            )(src2, dst2, et2, z_feat, rel_feat)
            return out[0, :E]
        except Exception:
            # In-kernel dynamic row gather needs recent Mosaic gather support;
            # if lowering is unavailable, silently use the streaming fallback.
            pass

    # ----------------------------------------------------------------------
    # Fallback: XLA row gathers, stream (tile, H) blocks through the kernel.
    # TODO(synk): for node tables too large for VMEM residency, replace this
    # with PrefetchScalarGridSpec + a manual per-tile DMA gather
    # (memory_space=pl.ANY + pltpu.make_async_copy) to avoid the (E, H)
    # round-trip.  If profiling on v5e shows exposed DMA here, add
    # pipeline_mode=pl.Buffered(3) on the three streamed BlockSpecs.
    # ----------------------------------------------------------------------
    z_src = jnp.take(z_feat, src, axis=0)          # (e_pad, H)
    z_dst = jnp.take(z_feat, dst, axis=0)          # (e_pad, H)
    rel_g = jnp.take(rel_feat, et, axis=0)         # (e_pad, H)

    feat_item = jnp.dtype(z_src.dtype).itemsize
    fb_need = (6 * tile * H * feat_item            # 3 streams x2 buffers
               + 4 * tile * 4                      # output x2 buffers
               + 4 * tile * H * 4)                 # f32 intermediates
    vmem_limit = int(min(0.85 * vmem_cap, max(2 * fb_need, 16 << 20)))

    out = pl.pallas_call(
        _distmult_streaming_kernel,
        out_shape=out_shape,
        grid=grid,
        in_specs=[
            pl.BlockSpec((tile, H), lambda i: (i, 0)),
            pl.BlockSpec((tile, H), lambda i: (i, 0)),
            pl.BlockSpec((tile, H), lambda i: (i, 0)),
        ],
        out_specs=out_spec,
        compiler_params=pltpu.CompilerParams(
            dimension_semantics=("parallel",),
            vmem_limit_bytes=vmem_limit,
        ),
    )(z_src, z_dst, rel_g)
    return out[0, :E]


def xavier_uniform(key, shape, dtype=jnp.float32):
    fan_in, fan_out = shape[0], shape[1]
    bound = float(np.sqrt(6.0 / (fan_in + fan_out)))
    return jax.random.uniform(key, shape, dtype=dtype, minval=-bound, maxval=bound)


if __name__ == "__main__":
    key = jax.random.PRNGKey(0)
    k_rel, k_z, k_src, k_dst, k_type = jax.random.split(key, 5)

    # --- Case 1: small shapes matching the module spec (fused, resident z) ---
    num_relations, hidden_channels, num_nodes, num_edges = 4, 32, 6, 8
    rel_emb = xavier_uniform(k_rel, (num_relations, hidden_channels))
    z = jax.random.normal(k_z, (num_nodes, hidden_channels), dtype=jnp.float32)
    src = jax.random.randint(k_src, (num_edges,), 0, num_nodes, dtype=jnp.int32)
    dst = jax.random.randint(k_dst, (num_edges,), 0, num_nodes, dtype=jnp.int32)
    edge_index = jnp.stack([src, dst], axis=0)               # (2, E)
    edge_type = jax.random.randint(k_type, (num_edges,), 0, num_relations,
                                   dtype=jnp.int32)

    out = jax.block_until_ready(
        distmult_decoder_forward(z, edge_index, edge_type, rel_emb))
    ref = jnp.sum(z[edge_index[0]] * rel_emb[edge_type] * z[edge_index[1]], axis=1)
    assert out.shape == (num_edges,), out.shape
    np.testing.assert_allclose(np.asarray(out), np.asarray(ref),
                               rtol=1e-5, atol=1e-5)

    # --- Case 2: exercises index padding + multi-step parallel grid ---
    kk = jax.random.split(jax.random.PRNGKey(1), 5)
    R2, H2, N2, E2 = 5, 32, 64, 300
    rel_emb2 = xavier_uniform(kk[0], (R2, H2))
    z2 = jax.random.normal(kk[1], (N2, H2), dtype=jnp.float32)
    ei2 = jnp.stack(
        [jax.random.randint(kk[2], (E2,), 0, N2, dtype=jnp.int32),
         jax.random.randint(kk[3], (E2,), 0, N2, dtype=jnp.int32)], axis=0)
    et2 = jax.random.randint(kk[4], (E2,), 0, R2, dtype=jnp.int32)

    out2 = jax.block_until_ready(
        distmult_decoder_forward(z2, ei2, et2, rel_emb2, tile_e=128))
    ref2 = jnp.sum(z2[ei2[0]] * rel_emb2[et2] * z2[ei2[1]], axis=1)
    np.testing.assert_allclose(np.asarray(out2), np.asarray(ref2),
                               rtol=1e-5, atol=1e-5)

    # --- Case 3: explicitly exercise the streaming fallback kernel ---
    out3 = jax.block_until_ready(
        distmult_decoder_forward(z2, ei2, et2, rel_emb2, tile_e=128,
                                 fuse_gather=False))
    np.testing.assert_allclose(np.asarray(out3), np.asarray(ref2),
                               rtol=1e-5, atol=1e-5)

    print("KERNEL_OK")
</pallas_src>

<mosaic_0001>
module attributes {stable_mosaic.version = 11 : i64} {
  func.func @_distmult_streaming_kernel(%arg0: i32, %arg1: memref<128x32xf32, #tpu.memory_space<vmem>>, %arg2: memref<128x32xf32, #tpu.memory_space<vmem>>, %arg3: memref<128x32xf32, #tpu.memory_space<vmem>>, %arg4: memref<1x128xf32, #tpu.memory_space<vmem>>) attributes {dimension_semantics = [#tpu.dimension_semantics<parallel>], iteration_bounds = array<i64: 1>, scalar_prefetch = 0 : i64, scratch_operands = 0 : i64, tpu.core_type = #tpu.core_type<tc>, window_params = [{transform_indices = @transform_0, window_bounds = array<i64: 128, 32>}, {transform_indices = @transform_1, window_bounds = array<i64: 128, 32>}, {transform_indices = @transform_2, window_bounds = array<i64: 128, 32>}, {transform_indices = @transform_3, window_bounds = array<i64: 1, 128>}]} {
    %c0 = arith.constant 0 : index
    %c0_0 = arith.constant 0 : index
    %0 = vector.load %arg1[%c0, %c0_0] : memref<128x32xf32, #tpu.memory_space<vmem>>, vector<128x32xf32>
    %c0_1 = arith.constant 0 : index
    %c0_2 = arith.constant 0 : index
    %1 = vector.load %arg3[%c0_1, %c0_2] : memref<128x32xf32, #tpu.memory_space<vmem>>, vector<128x32xf32>
    %2 = arith.mulf %0, %1 : vector<128x32xf32>
    %c0_3 = arith.constant 0 : index
    %c0_4 = arith.constant 0 : index
    %3 = vector.load %arg2[%c0_3, %c0_4] : memref<128x32xf32, #tpu.memory_space<vmem>>, vector<128x32xf32>
    %4 = arith.mulf %2, %3 : vector<128x32xf32>
    %cst = arith.constant dense<0.000000e+00> : vector<128xf32>
    %5 = vector.multi_reduction <add>, %4, %cst [1] : vector<128x32xf32> to vector<128xf32>
    %6 = vector.shape_cast %5 : vector<128xf32> to vector<1x128xf32>
    %c0_5 = arith.constant 0 : index
    %c0_6 = arith.constant 0 : index
    %7 = vector.load %arg4[%c0_5, %c0_6] : memref<1x128xf32, #tpu.memory_space<vmem>>, vector<1x128xf32>
    tpu.vector_store %arg4[%c0_5, %c0_6], %6 {strides = array<i32>} : memref<1x128xf32, #tpu.memory_space<vmem>>, vector<1x128xf32>,
    return
  }
  func.func @transform_0(%arg0: i32) -> (i32, i32) {
    %c0_i32 = arith.constant 0 : i32
    %c0_i32_0 = arith.constant 0 : i32
    return %arg0, %c0_i32 : i32, i32
  }
  func.func @transform_1(%arg0: i32) -> (i32, i32) {
    %c0_i32 = arith.constant 0 : i32
    %c0_i32_0 = arith.constant 0 : i32
    return %arg0, %c0_i32 : i32, i32
  }
  func.func @transform_2(%arg0: i32) -> (i32, i32) {
    %c0_i32 = arith.constant 0 : i32
    %c0_i32_0 = arith.constant 0 : i32
    return %arg0, %c0_i32 : i32, i32
  }
  func.func @transform_3(%arg0: i32) -> (i32, i32) {
    %c0_i32 = arith.constant 0 : i32
    %c0_i32_0 = arith.constant 0 : i32
    return %c0_i32, %arg0 : i32, i32
  }
}

</mosaic_0001>

<bundles_post_ra>
// kernel: tpu_custom_call.1
= control target key start
LH: loop header
LB: loop body
LE: loop exit
PB: predicated region body
PF: predicated region fallthrough
CT: control target
= control target key end

     0   :  { %vm95_vm0 = vcmask 261120   ;;  %s530_s0 = inlined_call_operand.vmem [shape: f32[128,32], index: 0, kind: input, shape index: {}]   ;;  %s531_s1 = inlined_call_operand.vmem [shape: f32[128,32], index: 1, kind: input, shape index: {}]   ;;  %s532_s2 = inlined_call_operand.vmem [shape: f32[128,32], index: 2, kind: input, shape index: {}]   ;;  %s533_s3 = inlined_call_operand.hbm [shape: f32[1,128], index: 3, kind: output, shape index: {}]  }
   0x1   :  { %v15_v0 = vld [vmem:[%s530_s0] sm:$0xff]  ;;  %v17_v4 = vld [vmem:[%s530_s0 + $0x10] sm:$0xff]  ;;  %v16_v8 = vld [vmem:[%s530_s0 + $0x8] sm:$0xff] }
   0x2   :  { %v31_v1 = vld [vmem:[%s532_s2] sm:$0xff]  ;;  %v33_v5 = vld [vmem:[%s532_s2 + $0x10] sm:$0xff]  ;;  %v32_v9 = vld [vmem:[%s532_s2 + $0x8] sm:$0xff] }
   0x3   :  { %v63_v2 = vld [vmem:[%s531_s1] sm:$0xff]  ;;  %v47_v3 = vmul.f32 %v31_v1, %v15_v0  ;;  %v65_v6 = vld [vmem:[%s531_s1 + $0x10] sm:$0xff]  ;;  %v49_v7 = vmul.f32 %v33_v5, %v17_v4  ;;  %v64_v10 = vld [vmem:[%s531_s1 + $0x8] sm:$0xff]  ;;  %v48_v12 = vmul.f32 %v32_v9, %v16_v8 }
   0x4   :  { %v18_v13 = vld [vmem:[%s530_s0 + $0x18] sm:$0xff]  ;;  %v19_v18 = vld [vmem:[%s530_s0 + $0x20] sm:$0xff]  ;;  %v20_v24 = vld [vmem:[%s530_s0 + $0x28] sm:$0xff] }
   0x5   :  { %v79_v11 = vmul.f32 %v63_v2, %v47_v3  ;;  %v34_v14 = vld [vmem:[%s532_s2 + $0x18] sm:$0xff]  ;;  %v81_v16 = vmul.f32 %v65_v6, %v49_v7  ;;  %v35_v19 = vld [vmem:[%s532_s2 + $0x20] sm:$0xff]  ;;  %v80_v22 = vmul.f32 %v64_v10, %v48_v12  ;;  %v36_v25 = vld [vmem:[%s532_s2 + $0x28] sm:$0xff] }
   0x6   :  { %v66_v15 = vld [vmem:[%s531_s1 + $0x18] sm:$0xff]  ;;  %v50_v17 = vmul.f32 %v34_v14, %v18_v13  ;;  %v67_v20 = vld [vmem:[%s531_s1 + $0x20] sm:$0xff]  ;;  %v51_v23 = vmul.f32 %v35_v19, %v19_v18  ;;  %v68_v26 = vld [vmem:[%s531_s1 + $0x28] sm:$0xff]  ;;  %v52_v29 = vmul.f32 %v36_v25, %v20_v24 }
   0x7   :  { %v96_v21 = vsel %vm95_vm0, %v79_v11, 0.0  ;;  %v102_v27 = vsel %vm95_vm0, %v81_v16, 0.0  ;;  %v21_v30 = vld [vmem:[%s530_s0 + $0x30] sm:$0xff]  ;;  %v99_v32 = vsel %vm95_vm0, %v80_v22, 0.0  ;;  %v22_v35 = vld [vmem:[%s530_s0 + $0x38] sm:$0xff]  ;;  %v23_v41 = vld [vmem:[%s530_s0 + $0x40] sm:$0xff] }
   0x8   :  { %97 = vadd.xlane.f32.xlu0 %v96_v21  ;;  %v82_v28 = vmul.f32 %v66_v15, %v50_v17  ;;  %v37_v31 = vld [vmem:[%s532_s2 + $0x30] sm:$0xff]  ;;  %103 = vadd.xlane.f32.xlu1 %v102_v27  ;;  %v83_v33 = vmul.f32 %v67_v20, %v51_v23  ;;  %v38_v36 = vld [vmem:[%s532_s2 + $0x38] sm:$0xff]  ;;  %v84_v38 = vmul.f32 %v68_v26, %v52_v29  ;;  %v39_v42 = vld [vmem:[%s532_s2 + $0x40] sm:$0xff] }
   0x9   :  { %v53_v34 = vmul.f32 %v37_v31, %v21_v30  ;;  %v69_v39 = vld [vmem:[%s531_s1 + $0x30] sm:$0xff]  ;;  %v54_v40 = vmul.f32 %v38_v36, %v22_v35  ;;  %v70_v43 = vld [vmem:[%s531_s1 + $0x38] sm:$0xff]  ;;  %v24_v44 = vld [vmem:[%s530_s0 + $0x48] sm:$0xff]  ;;  %v55_v48 = vmul.f32 %v39_v42, %v23_v41 }
   0xa   :  { %v105_v37 = vsel %vm95_vm0, %v82_v28, 0.0  ;;  %v40_v45 = vld [vmem:[%s532_s2 + $0x48] sm:$0xff]  ;;  %v108_v46 = vsel %vm95_vm0, %v83_v33, 0.0  ;;  %v111_v49 = vsel %vm95_vm0, %v84_v38, 0.0  ;;  %v71_v51 = vld [vmem:[%s531_s1 + $0x40] sm:$0xff]  ;;  %v25_v53 = vld [vmem:[%s530_s0 + $0x50] sm:$0xff] }
   0xb   :  { %v85_v47 = vmul.f32 %v69_v39, %v53_v34  ;;  %v86_v50 = vmul.f32 %v70_v43, %v54_v40  ;;  %v56_v52 = vmul.f32 %v40_v45, %v24_v44  ;;  %v41_v54 = vld [vmem:[%s532_s2 + $0x50] sm:$0xff]  ;;  %v72_v55 = vld [vmem:[%s531_s1 + $0x48] sm:$0xff]  ;;  %v26_v56 = vld [vmem:[%s530_s0 + $0x58] sm:$0xff]  ;;  %v87_v59 = vmul.f32 %v71_v51, %v55_v48 }
   0xc   :  { %100 = vadd.xlane.f32.xlu0 %v99_v32  ;;  %106 = vadd.xlane.f32.xlu1 %v105_v37  ;;  %v42_v57 = vld [vmem:[%s532_s2 + $0x58] sm:$0xff]  ;;  %v57_v60 = vmul.f32 %v41_v54, %v25_v53  ;;  %v73_v61 = vld [vmem:[%s531_s1 + $0x50] sm:$0xff]  ;;  %v27_v1 = vld [vmem:[%s530_s0 + $0x60] sm:$0xff] }
   0xd   :  { %v114_v58 = vsel %vm95_vm0, %v85_v47, 0.0  ;;  %v117_v62 = vsel %vm95_vm0, %v86_v50, 0.0  ;;  %v88_v63 = vmul.f32 %v72_v55, %v56_v52  ;;  %v58_v0 = vmul.f32 %v42_v57, %v26_v56  ;;  %v43_v2 = vld [vmem:[%s532_s2 + $0x60] sm:$0xff] }
  0x10   :  { %109 = vadd.xlane.f32.xlu0 %v108_v46  ;;  %112 = vadd.xlane.f32.xlu1 %v111_v49 }
  0x11   :  { %8 = vsyncpa [#allocation3], 0  ;;  %v74_v3 = vld [vmem:[%s531_s1 + $0x58] sm:$0xff]  ;;  %v28_v4 = vld [vmem:[%s530_s0 + $0x68] sm:$0xff]  ;;  %v120_v6 = vsel %vm95_vm0, %v87_v59, 0.0  ;;  %v89_v7 = vmul.f32 %v73_v61, %v57_v60  ;;  %v59_v8 = vmul.f32 %v43_v2, %v27_v1  ;;  %v123_v9 = vsel %vm95_vm0, %v88_v63, 0.0 }
  0x12   :  { %v44_v5 = vld [vmem:[%s532_s2 + $0x68] sm:$0xff]  ;;  %v90_v10 = vmul.f32 %v74_v3, %v58_v0  ;;  %v75_v11 = vld [vmem:[%s531_s1 + $0x60] sm:$0xff]  ;;  %v29_v13 = vld [vmem:[%s530_s0 + $0x70] sm:$0xff]  ;;  %v160_v32 = vlaneseq  ;;  %vm171_vm1 = vcmask 130112   ;;  %vm178_vm2 = vcmask 195712  }
  0x13   :  { %v60_v12 = vmul.f32 %v44_v5, %v28_v4  ;;  %v45_v14 = vld [vmem:[%s532_s2 + $0x70] sm:$0xff]  ;;  %v76_v15 = vld [vmem:[%s531_s1 + $0x68] sm:$0xff]  ;;  %v30_v16 = vld [vmem:[%s530_s0 + $0x78] sm:$0xff]  ;;  %v126_v18 = vsel %vm95_vm0, %v89_v7, 0.0  ;;  %v91_v19 = vmul.f32 %v75_v11, %v59_v8  ;;  %vm185_vm3 = vcmask 261312  }
  0x14   :  { %115 = vadd.xlane.f32.xlu0 %v114_v58  ;;  %118 = vadd.xlane.f32.xlu1 %v117_v62  ;;  %v46_v17 = vld [vmem:[%s532_s2 + $0x78] sm:$0xff]  ;;  %v61_v20 = vmul.f32 %v45_v14, %v29_v13  ;;  %v129_v21 = vsel %vm95_vm0, %v90_v10, 0.0  ;;  %v77_v23 = vld [vmem:[%s531_s1 + $0x70] sm:$0xff]  ;;  %v491_v33 = vand.u32 127, %v160_v32  ;;  %v493_v34 = vshrl.u32 %v160_v32, 7 }
  0x15   :  { %v92_v22 = vmul.f32 %v76_v15, %v60_v12  ;;  %v62_v24 = vmul.f32 %v46_v17, %v30_v16  ;;  %v78_v25 = vld [vmem:[%s531_s1 + $0x78] sm:$0xff]  ;;  %v132_v26 = vsel %vm95_vm0, %v91_v19, 0.0  ;;  %vm192_vm4 = vcmask 326912   ;;  %s310_s1 = smov [#allocation2]  }
  0x16   :  { %v93_v27 = vmul.f32 %v77_v23, %v61_v20  ;;  %v166_v35 = vadd.s32 4294967288, %v491_v33  ;;  %v173_v36 = vadd.s32 4294967280, %v491_v33  ;;  %v180_v37 = vadd.s32 4294967272, %v491_v33  ;;  %s279_s2 = sshll.u32 %s310_s1, 4  ;;  %s280_s2 = int_to_ptr.vmem [resolvable:$true] %s279_s2 }
  0x17   :  { %v135_v28 = vsel %vm95_vm0, %v92_v22, 0.0  ;;  %v94_v29 = vmul.f32 %v78_v25, %v62_v24  ;;  %v164_v39 = vsub.s32 %v491_v33, %v493_v34  ;;  %v187_v42 = vadd.s32 4294967264, %v491_v33  ;;  %s288_s26 = scalar_lea.vmem %s280_s2, 16  ;;  %s292_s27 = scalar_lea.vmem %s280_s2, 32 }
  0x18   :  { %121 = vadd.xlane.f32.xlu0 %v120_v6  ;;  %124 = vadd.xlane.f32.xlu1 %v123_v9  ;;  %v138_v30 = vsel %vm95_vm0, %v93_v27, 0.0  ;;  %v169_v41 = vsub.s32 %v166_v35, %v493_v34  ;;  %v176_v43 = vsub.s32 %v173_v36, %v493_v34  ;;  %v183_v44 = vsub.s32 %v180_v37, %v493_v34  ;;  %p289_p0 = scmp.ne.s32.totalorder %s280_s2, %s288_s26  ;;  %p293_p1 = scmp.lt.s32.totalorder %s280_s2, %s280_s2 }
  0x19   :  { %v141_v31 = vsel %vm95_vm0, %v94_v29, 0.0  ;;  %v194_v45 = vadd.s32 4294967256, %v491_v33  ;;  %v190_v50 = vsub.s32 %v187_v42, %v493_v34  ;;  %v201_v51 = vadd.s32 4294967248, %v491_v33  ;;  %p294_p2 = scmp.lt.s32.totalorder %s292_s27, %s288_s26 }
  0x1a   :  { %v208_v55 = vadd.s32 4294967240, %v491_v33  ;;  %v215_v63 = vadd.s32 4294967232, %v491_v33  ;;  %v222_v2 = vadd.s32 4294967224, %v491_v33  ;;  %vm199_vm5 = vcmask 392512  }
  0x1b   :  { %v197_v54 = vsub.s32 %v194_v45, %v493_v34  ;;  %v204_v62 = vsub.s32 %v201_v51, %v493_v34  ;;  %vm206_vm6 = vcmask 458112   ;;  %v229_v8 = vadd.s32 4294967216, %v491_v33  ;;  %p295_p3 = por %p294_p2, %p293_p1 }
  0x1c   :  { %127 = vadd.xlane.f32.xlu0 %v126_v18  ;;  %130 = vadd.xlane.f32.xlu1 %v129_v21  ;;  %v211_v1 = vsub.s32 %v208_v55, %v493_v34  ;;  %v218_v7 = vsub.s32 %v215_v63, %v493_v34  ;;  %v225_v11 = vsub.s32 %v222_v2, %v493_v34  ;;  %v236_v12 = vadd.s32 4294967208, %v491_v33 }
  0x1d   :  { %vm213_vm7 = vcmask 523712   ;;  %vm220_vm8 = vcmask 589312   ;;  %v232_v17 = vsub.s32 %v229_v8, %v493_v34  ;;  %v243_v18 = vadd.s32 4294967200, %v491_v33  ;;  %p296_p4 = pnand %p295_p3, %p289_p0 }
  0x1e   :  { %v239_v21 = vsub.s32 %v236_v12, %v493_v34  ;;  %v250_v22 = vadd.s32 4294967192, %v491_v33  ;;  %vm227_vm9 = vcmask 654912   ;;  %vm234_vm10 = vcmask 720512  }
  0x1f   :  { %v246_v27 = vsub.s32 %v243_v18, %v493_v34  ;;  %v264_v32 = vadd.s32 4294967176, %v491_v33  ;;  %vm241_vm11 = vcmask 786112   ;;  %vm248_vm12 = vcmask 851712  }
  0x20   :  { %133 = vadd.xlane.f32.xlu0 %v132_v26  ;;  %136 = vadd.xlane.f32.xlu1 %v135_v28  ;;  %v257_v28 = vadd.s32 4294967184, %v491_v33  ;;  %vm255_vm13 = vcmask 917312   ;;  %vm262_vm14 = vcmask 982912   ;;  %vm269_vm15 = vcmask 1048512  }
  0x21   :  { %v267_v42 = vsub.s32 %v264_v32, %v493_v34 }
  0x24   :  { %139 = vadd.xlane.f32.xlu0 %v138_v30  ;;  %142 = vadd.xlane.f32.xlu1 %v141_v31  ;;  %v253_v31 = vsub.s32 %v250_v22, %v493_v34 }
  0x91   :  { %v98_v38 = vpop.xlane.xlu0 %97  ;;  %v104_v40 = vpop.xlane.xlu1 %103 }
  0x92   :  { %v165_v47 = vrot.slane %v98_v38, %v164_v39  ;;  %v177_v52 = vrot.slane %v104_v40, %v176_v43  ;;  %v260_v39 = vsub.s32 %v257_v28, %v493_v34 }
  0x95   :  { %v101_v46 = vpop.xlane.xlu0 %100  ;;  %v107_v49 = vpop.xlane.xlu1 %106 }
  0x96   :  { %v170_v48 = vrot.slane %v101_v46, %v169_v41  ;;  %v184_v53 = vrot.slane %v107_v49, %v183_v44 }
  0x98   :  { %v172_v56 = vsel %vm171_vm1, %v170_v48, %v165_v47 }
  0x99   :  { %v179_v57 = vsel %vm178_vm2, %v177_v52, %v172_v56  ;;  %v110_v58 = vpop.xlane.xlu0 %109  ;;  %v113_v61 = vpop.xlane.xlu1 %112 }
  0x9a   :  { %v186_v59 = vsel %vm185_vm3, %v184_v53, %v179_v57  ;;  %v191_v60 = vrot.slane %v110_v58, %v190_v50  ;;  %v198_v0 = vrot.slane %v113_v61, %v197_v54 }
  0x9c   :  { %v193_v3 = vsel %vm192_vm4, %v191_v60, %v186_v59 }
  0x9d   :  { %v116_v4 = vpop.xlane.xlu0 %115  ;;  %v119_v6 = vpop.xlane.xlu1 %118  ;;  %v200_v9 = vsel %vm199_vm5, %v198_v0, %v193_v3 }
  0x9e   :  { %v205_v5 = vrot.slane %v116_v4, %v204_v62  ;;  %v212_v10 = vrot.slane %v119_v6, %v211_v1 }
  0xa0   :  { %v207_v13 = vsel %vm206_vm6, %v205_v5, %v200_v9 }
  0xa1   :  { %v122_v14 = vpop.xlane.xlu0 %121  ;;  %v125_v16 = vpop.xlane.xlu1 %124  ;;  %v214_v19 = vsel %vm213_vm7, %v212_v10, %v207_v13 }
  0xa2   :  { %v219_v15 = vrot.slane %v122_v14, %v218_v7  ;;  %v226_v20 = vrot.slane %v125_v16, %v225_v11 }
  0xa4   :  { %v221_v23 = vsel %vm220_vm8, %v219_v15, %v214_v19 }
  0xa5   :  { %v128_v24 = vpop.xlane.xlu0 %127  ;;  %v131_v26 = vpop.xlane.xlu1 %130  ;;  %v228_v29 = vsel %vm227_vm9, %v226_v20, %v221_v23 }
  0xa6   :  { %v233_v25 = vrot.slane %v128_v24, %v232_v17  ;;  %v240_v30 = vrot.slane %v131_v26, %v239_v21 }
  0xa8   :  { %v235_v35 = vsel %vm234_vm10, %v233_v25, %v228_v29 }
  0xa9   :  { %v134_v36 = vpop.xlane.xlu0 %133  ;;  %v137_v38 = vpop.xlane.xlu1 %136  ;;  %v242_v40 = vsel %vm241_vm11, %v240_v30, %v235_v35 }
  0xaa   :  { %v247_v37 = vrot.slane %v134_v36, %v246_v27  ;;  %v254_v41 = vrot.slane %v137_v38, %v253_v31 }
  0xac   :  { %v249_v43 = vsel %vm248_vm12, %v247_v37, %v242_v40 }
  0xad   :  { %v140_v44 = vpop.xlane.xlu0 %139  ;;  %v143_v33 = vpop.xlane.xlu1 %142  ;;  %v256_v46 = vsel %vm255_vm13, %v254_v41, %v249_v43 }
  0xae   :  { %v261_v45 = vrot.slane %v140_v44, %v260_v39  ;;  %v268_v47 = vrot.slane %v143_v33, %v267_v42 }
  0xb0   :  { %v263_v48 = vsel %vm262_vm14, %v261_v45, %v256_v46 }
  0xb1   :  { %v270_v49 = vsel %vm269_vm15, %v268_v47, %v263_v48 }
  0xb2   :  { %272 = vst [vmem:[#allocation2] sm:$0x1] %v270_v49 }
  0xb3   :  { %299 = shalt.err (!%p296_p4)
}
  0xb4   :  { %282 = dma.vmem_to_hbm [thread:$0]  %s280_s2, 16, %s533_s3, [#allocation3]  }
  0xb5   :  { %308 = dma.done.wait [#allocation3], 16  }
  0xb6   :  { %309 = vsyncadd [#allocation3], 4294967280 }
  0xb7   :  { %286 = vsyncpa [#allocation3], 1 }

</bundles_post_ra>
